<compile_context>
chip_gen: v7x
topology: tpu7x:2x2x1
jax: 0.10.0
libtpu: 0.0.40
codegen_flags: <defaults>
</compile_context>

<pallas_src>
import functools

import jax
import jax.numpy as jnp
from jax.experimental import pallas as pl
from jax.experimental.pallas import tpu as pltpu

LANES = 128  # lane width: output/logits are padded to this for unmasked stores


def _round_up(x, m):
    return (x + m - 1) // m * m


def net_kernel(x_ref, w1_ref, b1_ref, w2t_ref, b2_ref, o_ref,
               logits_buf, m_sc, s_sc, *, n_valid, tile_rows):
    phase = pl.program_id(0)   # 0: logits + online softmax stats, 1: normalize/store
    i = pl.program_id(1)       # batch tile index
    row0 = pl.multiple_of(i * tile_rows, tile_rows)

    # Mask for padded batch rows: softmax over dim=0 must only see real rows.
    row_ids = row0 + jax.lax.broadcasted_iota(jnp.int32, (tile_rows, 1), 0)
    valid = row_ids < n_valid                                     # (TB, 1) bool

    @pl.when(phase == 0)
    def _():
        @pl.when(i == 0)
        def _():
            m_sc[...] = jnp.full(m_sc.shape, -jnp.inf, m_sc.dtype)
            s_sc[...] = jnp.zeros(s_sc.shape, s_sc.dtype)

        # ---- fc1 on the VPU: K=4 broadcast-FMAs (MXU would be ~0.1% utilized) ----
        x = x_ref[...]                                            # (TB, 4)
        w1 = w1_ref[...]                                          # (4, 150)
        h = jnp.broadcast_to(b1_ref[...], (tile_rows, w1.shape[1]))
        for k in range(x.shape[1]):                               # unrolled, 4 steps
            h = h + x[:, k:k + 1] * w1[k:k + 1, :]
        h = jnp.where(h >= 0.0, h, jnp.float32(0.01) * h)         # leaky_relu(0.01)

        # ---- fc2 on the VPU: N=2 multiply + lane-reduce against (2, 150) W^T ----
        w2t = w2t_ref[...]                                        # (2, 150)
        lane = jax.lax.broadcasted_iota(jnp.int32, (tile_rows, LANES), 1)
        logits = jnp.broadcast_to(b2_ref[...], (tile_rows, LANES))  # lane-dense bias
        for c in range(w2t.shape[0]):                             # unrolled, 2 steps
            col = jnp.sum(h * w2t[c:c + 1, :], axis=-1, keepdims=True)  # (TB, 1)
            logits = logits + jnp.where(lane == c, col, 0.0)

        # Cache lane-dense logits for phase 1 (avoids recompute / re-DMA of x).
        logits_buf[pl.ds(row0, tile_rows), :] = logits

        # ---- online softmax statistics over the batch axis (global reduction) ----
        lmask = jnp.where(valid, logits, -jnp.inf)
        m_new = jnp.maximum(m_sc[...], jnp.max(lmask, axis=0, keepdims=True))
        p = jnp.where(valid, jnp.exp(logits - m_new), 0.0)
        s_sc[...] = s_sc[...] * jnp.exp(m_sc[...] - m_new) + jnp.sum(
            p, axis=0, keepdims=True)
        m_sc[...] = m_new

    @pl.when(phase == 1)
    def _():
        logits = logits_buf[pl.ds(row0, tile_rows), :]
        inv_s = pl.reciprocal(s_sc[...], approx=False)   # exact; keeps 1e-5 tolerance
        probs = jnp.exp(logits - m_sc[...]) * inv_s
        o_ref[...] = jnp.where(valid, probs, 0.0).astype(o_ref.dtype)


def net_forward(x, w1, b1, w2, b2, *, tile_rows=None):
    B, K = x.shape           # (batch, 4)
    H = w1.shape[1]          # 150
    N = w2.shape[1]          # 2

    if tile_rows is None:
        tile_rows = min(_round_up(B, 8), 512)   # big batches: 512-row tiles
    tile_rows = _round_up(tile_rows, 8)
    b_pad = _round_up(B, tile_rows)
    num_tiles = b_pad // tile_rows

    x_pad = x if b_pad == B else jnp.pad(x, ((0, b_pad - B), (0, 0)))
    w2t = w2.T                                     # (2, 150): lane-major for VPU fc2
    b2p = jnp.pad(b2, ((0, 0), (0, LANES - N)))    # lane-dense bias (layout plumbing)

    kernel = functools.partial(net_kernel, n_valid=B, tile_rows=tile_rows)

    out_pad = pl.pallas_call(
        kernel,
        out_shape=jax.ShapeDtypeStruct((b_pad, LANES), jnp.float32),
        grid_spec=pltpu.PrefetchScalarGridSpec(
            num_scalar_prefetch=0,
            grid=(2, num_tiles),                   # (softmax phase, batch tile)
            in_specs=[
                # x tiles are only consumed in phase 0; pin to block 0 in phase 1.
                pl.BlockSpec((tile_rows, K), lambda p, i: ((1 - p) * i, 0)),
                pl.BlockSpec((K, H), lambda p, i: (0, 0)),        # w1  resident
                pl.BlockSpec((1, H), lambda p, i: (0, 0)),        # b1  resident
                pl.BlockSpec((N, H), lambda p, i: (0, 0)),        # w2^T resident
                pl.BlockSpec((1, LANES), lambda p, i: (0, 0)),    # b2 (padded) resident
            ],
            # Phase 0 never writes the output: keep its block index pinned so no
            # garbage write-backs happen; phase 1 walks the batch tiles.
            out_specs=pl.BlockSpec((tile_rows, LANES), lambda p, i: (p * i, 0)),
            scratch_shapes=[
                pltpu.VMEM((b_pad, LANES), jnp.float32),   # logits for the whole batch
                pltpu.VMEM((1, LANES), jnp.float32),       # running column max
                pltpu.VMEM((1, LANES), jnp.float32),       # running column sum
            ],
        ),
        compiler_params=pltpu.CompilerParams(
            # softmax(dim=0) couples all batch rows -> both grid axes sequential.
            dimension_semantics=("arbitrary", "arbitrary"),
        ),
    )(x_pad, w1, b1, w2t, b2p)

    return out_pad[:B, :N]


def net_reference(x, w1, b1, w2, b2):
    # Pure-JAX reference in full f32 (HIGHEST precision so XLA doesn't down-cast).
    h = jnp.dot(x, w1, precision=jax.lax.Precision.HIGHEST) + b1
    h = jnp.where(h >= 0, h, 0.01 * h)
    logits = jnp.dot(h, w2, precision=jax.lax.Precision.HIGHEST) + b2
    return jax.nn.softmax(logits, axis=0)


def init_params(key):
    # Deterministic init mimicking PyTorch nn.Linear default:
    # uniform(-1/sqrt(fan_in), 1/sqrt(fan_in)); stored as (in_features, out_features).
    k1, k2, k3, k4 = jax.random.split(key, 4)
    lim1 = 1.0 / jnp.sqrt(4.0)
    lim2 = 1.0 / jnp.sqrt(150.0)
    w1 = jax.random.uniform(k1, (4, 150), jnp.float32, -lim1, lim1)
    b1 = jax.random.uniform(k2, (1, 150), jnp.float32, -lim1, lim1)
    w2 = jax.random.uniform(k3, (150, 2), jnp.float32, -lim2, lim2)
    b2 = jax.random.uniform(k4, (1, 2), jnp.float32, -lim2, lim2)
    return w1, b1, w2, b2


if __name__ == "__main__":
    key = jax.random.PRNGKey(0)
    k_x1, k_x2, k_p = jax.random.split(key, 3)
    w1, b1, w2, b2 = init_params(k_p)

    # Small batch of CartPole-like states (4 features each): single tile path.
    x_small = jax.random.normal(k_x1, (8, 4), dtype=jnp.float32)
    out_small = jax.block_until_ready(net_forward(x_small, w1, b1, w2, b2))
    ref_small = net_reference(x_small, w1, b1, w2, b2)
    assert out_small.shape == (8, 2)
    assert jnp.allclose(out_small, ref_small, atol=1e-5, rtol=1e-5), \
        "small-batch mismatch vs reference"

    # Batch not divisible by the tile: exercises multi-tile online softmax + masking.
    x_multi = jax.random.normal(k_x2, (20, 4), dtype=jnp.float32)
    out_multi = jax.block_until_ready(
        net_forward(x_multi, w1, b1, w2, b2, tile_rows=8))
    ref_multi = net_reference(x_multi, w1, b1, w2, b2)
    assert out_multi.shape == (20, 2)
    assert jnp.allclose(out_multi, ref_multi, atol=1e-5, rtol=1e-5), \
        "tiled-batch mismatch vs reference"

    print("KERNEL_OK")
</pallas_src>

<mosaic_0001>
module attributes {stable_mosaic.version = 11 : i64} {
  func.func @net_kernel(%arg0: i32, %arg1: i32, %arg2: memref<8x4xf32, #tpu.memory_space<vmem>>, %arg3: memref<4x150xf32, #tpu.memory_space<vmem>>, %arg4: memref<1x150xf32, #tpu.memory_space<vmem>>, %arg5: memref<2x150xf32, #tpu.memory_space<vmem>>, %arg6: memref<1x128xf32, #tpu.memory_space<vmem>>, %arg7: memref<8x128xf32, #tpu.memory_space<vmem>>, %arg8: memref<8x128xf32, #tpu.memory_space<vmem>>, %arg9: memref<1x128xf32, #tpu.memory_space<vmem>>, %arg10: memref<1x128xf32, #tpu.memory_space<vmem>>) attributes {dimension_semantics = [#tpu.dimension_semantics<arbitrary>, #tpu.dimension_semantics<arbitrary>], iteration_bounds = array<i64: 2, 1>, scalar_prefetch = 0 : i64, scratch_operands = 3 : i64, tpu.core_type = #tpu.core_type<tc>, window_params = [{transform_indices = @transform_0, window_bounds = array<i64: 8, 4>}, {pipeline_mode = #tpu.pipeline_mode<synchronous>, transform_indices = @transform_1, window_bounds = array<i64: 4, 150>}, {pipeline_mode = #tpu.pipeline_mode<synchronous>, transform_indices = @transform_2, window_bounds = array<i64: 1, 150>}, {pipeline_mode = #tpu.pipeline_mode<synchronous>, transform_indices = @transform_3, window_bounds = array<i64: 2, 150>}, {pipeline_mode = #tpu.pipeline_mode<synchronous>, transform_indices = @transform_4, window_bounds = array<i64: 1, 128>}, {transform_indices = @transform_5, window_bounds = array<i64: 8, 128>}]} {
    %c8_i32 = arith.constant 8 : i32
    %0 = arith.muli %arg1, %c8_i32 : i32
    %1 = tpu.assume_multiple %0, 8 : i32
    %2 = tpu.iota {dimensions = array<i32: 0>} : vector<8x1xi32>
    %3 = vector.broadcast %1 : i32 to vector<8x1xi32>
    %4 = arith.addi %3, %2 : vector<8x1xi32>
    %c8_i32_0 = arith.constant 8 : i32
    %5 = vector.broadcast %c8_i32_0 : i32 to vector<8x1xi32>
    %6 = arith.cmpi slt, %4, %5 : vector<8x1xi32>
    %c0_i32 = arith.constant 0 : i32
    %7 = arith.cmpi eq, %arg0, %c0_i32 : i32
    %8 = arith.extui %7 : i1 to i32
    %c0_i32_1 = arith.constant 0 : i32
    %9 = arith.cmpi ne, %8, %c0_i32_1 : i32
    scf.if %9 {
      %c0_i32_3 = arith.constant 0 : i32
      %13 = arith.cmpi eq, %arg1, %c0_i32_3 : i32
      %14 = arith.extui %13 : i1 to i32
      %c0_i32_4 = arith.constant 0 : i32
      %15 = arith.cmpi ne, %14, %c0_i32_4 : i32
      scf.if %15 {
        %cst_36 = arith.constant 0xFF800000 : f32
        %106 = vector.broadcast %cst_36 : f32 to vector<1x128xf32>
        %c0_37 = arith.constant 0 : index
        %c0_38 = arith.constant 0 : index
        %107 = vector.load %arg9[%c0_37, %c0_38] : memref<1x128xf32, #tpu.memory_space<vmem>>, vector<1x128xf32>
        tpu.vector_store %arg9[%c0_37, %c0_38], %106 {strides = array<i32>} : memref<1x128xf32, #tpu.memory_space<vmem>>, vector<1x128xf32>,
        %cst_39 = arith.constant 0.000000e+00 : f32
        %108 = vector.broadcast %cst_39 : f32 to vector<1x128xf32>
        %c0_40 = arith.constant 0 : index
        %c0_41 = arith.constant 0 : index
        %109 = vector.load %arg10[%c0_40, %c0_41] : memref<1x128xf32, #tpu.memory_space<vmem>>, vector<1x128xf32>
        tpu.vector_store %arg10[%c0_40, %c0_41], %108 {strides = array<i32>} : memref<1x128xf32, #tpu.memory_space<vmem>>, vector<1x128xf32>,
      } else {
      }
      %c0 = arith.constant 0 : index
      %c0_5 = arith.constant 0 : index
      %16 = vector.load %arg2[%c0, %c0_5] : memref<8x4xf32, #tpu.memory_space<vmem>>, vector<8x4xf32>
      %c0_6 = arith.constant 0 : index
      %c0_7 = arith.constant 0 : index
      %17 = vector.load %arg3[%c0_6, %c0_7] : memref<4x150xf32, #tpu.memory_space<vmem>>, vector<4x150xf32>
      %c0_8 = arith.constant 0 : index
      %c0_9 = arith.constant 0 : index
      %18 = vector.load %arg4[%c0_8, %c0_9] : memref<1x150xf32, #tpu.memory_space<vmem>>, vector<1x150xf32>
      %19 = vector.shape_cast %18 : vector<1x150xf32> to vector<1x150xf32>
      %20 = vector.broadcast %19 : vector<1x150xf32> to vector<8x150xf32>
      %21 = vector.extract_strided_slice %16 {offsets = [0, 0], sizes = [8, 1], strides = [1, 1]} : vector<8x4xf32> to vector<8x1xf32>
      %22 = vector.extract_strided_slice %17 {offsets = [0, 0], sizes = [1, 150], strides = [1, 1]} : vector<4x150xf32> to vector<1x150xf32>
      %23 = vector.broadcast %21 : vector<8x1xf32> to vector<8x150xf32>
      %24 = vector.broadcast %22 : vector<1x150xf32> to vector<8x150xf32>
      %25 = arith.mulf %23, %24 : vector<8x150xf32>
      %26 = arith.addf %20, %25 : vector<8x150xf32>
      %27 = vector.extract_strided_slice %16 {offsets = [0, 1], sizes = [8, 1], strides = [1, 1]} : vector<8x4xf32> to vector<8x1xf32>
      %28 = vector.extract_strided_slice %17 {offsets = [1, 0], sizes = [1, 150], strides = [1, 1]} : vector<4x150xf32> to vector<1x150xf32>
      %29 = vector.broadcast %27 : vector<8x1xf32> to vector<8x150xf32>
      %30 = vector.broadcast %28 : vector<1x150xf32> to vector<8x150xf32>
      %31 = arith.mulf %29, %30 : vector<8x150xf32>
      %32 = arith.addf %26, %31 : vector<8x150xf32>
      %33 = vector.extract_strided_slice %16 {offsets = [0, 2], sizes = [8, 1], strides = [1, 1]} : vector<8x4xf32> to vector<8x1xf32>
      %34 = vector.extract_strided_slice %17 {offsets = [2, 0], sizes = [1, 150], strides = [1, 1]} : vector<4x150xf32> to vector<1x150xf32>
      %35 = vector.broadcast %33 : vector<8x1xf32> to vector<8x150xf32>
      %36 = vector.broadcast %34 : vector<1x150xf32> to vector<8x150xf32>
      %37 = arith.mulf %35, %36 : vector<8x150xf32>
      %38 = arith.addf %32, %37 : vector<8x150xf32>
      %39 = vector.extract_strided_slice %16 {offsets = [0, 3], sizes = [8, 1], strides = [1, 1]} : vector<8x4xf32> to vector<8x1xf32>
      %40 = vector.extract_strided_slice %17 {offsets = [3, 0], sizes = [1, 150], strides = [1, 1]} : vector<4x150xf32> to vector<1x150xf32>
      %41 = vector.broadcast %39 : vector<8x1xf32> to vector<8x150xf32>
      %42 = vector.broadcast %40 : vector<1x150xf32> to vector<8x150xf32>
      %43 = arith.mulf %41, %42 : vector<8x150xf32>
      %44 = arith.addf %38, %43 : vector<8x150xf32>
      %cst = arith.constant 0.000000e+00 : f32
      %45 = vector.broadcast %cst : f32 to vector<8x150xf32>
      %46 = arith.cmpf oge, %44, %45 : vector<8x150xf32>
      %cst_10 = arith.constant 0.00999999977 : f32
      %47 = vector.broadcast %cst_10 : f32 to vector<8x150xf32>
      %48 = arith.mulf %47, %44 : vector<8x150xf32>
      %49 = arith.select %46, %44, %48 : vector<8x150xi1>, vector<8x150xf32>
      %c0_11 = arith.constant 0 : index
      %c0_12 = arith.constant 0 : index
      %50 = vector.load %arg5[%c0_11, %c0_12] : memref<2x150xf32, #tpu.memory_space<vmem>>, vector<2x150xf32>
      %51 = tpu.iota {dimensions = array<i32: 1>} : vector<8x128xi32>
      %c0_13 = arith.constant 0 : index
      %c0_14 = arith.constant 0 : index
      %52 = vector.load %arg6[%c0_13, %c0_14] : memref<1x128xf32, #tpu.memory_space<vmem>>, vector<1x128xf32>
      %53 = vector.shape_cast %52 : vector<1x128xf32> to vector<1x128xf32>
      %54 = vector.broadcast %53 : vector<1x128xf32> to vector<8x128xf32>
      %55 = vector.extract_strided_slice %50 {offsets = [0, 0], sizes = [1, 150], strides = [1, 1]} : vector<2x150xf32> to vector<1x150xf32>
      %56 = vector.broadcast %55 : vector<1x150xf32> to vector<8x150xf32>
      %57 = arith.mulf %49, %56 : vector<8x150xf32>
      %cst_15 = arith.constant dense<0.000000e+00> : vector<8xf32>
      %58 = vector.multi_reduction <add>, %57, %cst_15 [1] : vector<8x150xf32> to vector<8xf32>
      %59 = vector.shape_cast %58 : vector<8xf32> to vector<8x1xf32>
      %c0_i32_16 = arith.constant 0 : i32
      %60 = vector.broadcast %c0_i32_16 : i32 to vector<8x128xi32>
      %61 = arith.cmpi eq, %51, %60 : vector<8x128xi32>
      %cst_17 = arith.constant 0.000000e+00 : f32
      %62 = vector.shape_cast %59 : vector<8x1xf32> to vector<8x1xf32>
      %63 = vector.broadcast %62 : vector<8x1xf32> to vector<8x128xf32>
      %64 = vector.broadcast %cst_17 : f32 to vector<8x128xf32>
      %65 = arith.select %61, %63, %64 : vector<8x128xi1>, vector<8x128xf32>
      %66 = arith.addf %54, %65 : vector<8x128xf32>
      %67 = vector.extract_strided_slice %50 {offsets = [1, 0], sizes = [1, 150], strides = [1, 1]} : vector<2x150xf32> to vector<1x150xf32>
      %68 = vector.broadcast %67 : vector<1x150xf32> to vector<8x150xf32>
      %69 = arith.mulf %49, %68 : vector<8x150xf32>
      %cst_18 = arith.constant dense<0.000000e+00> : vector<8xf32>
      %70 = vector.multi_reduction <add>, %69, %cst_18 [1] : vector<8x150xf32> to vector<8xf32>
      %71 = vector.shape_cast %70 : vector<8xf32> to vector<8x1xf32>
      %c1_i32_19 = arith.constant 1 : i32
      %72 = vector.broadcast %c1_i32_19 : i32 to vector<8x128xi32>
      %73 = arith.cmpi eq, %51, %72 : vector<8x128xi32>
      %cst_20 = arith.constant 0.000000e+00 : f32
      %74 = vector.shape_cast %71 : vector<8x1xf32> to vector<8x1xf32>
      %75 = vector.broadcast %74 : vector<8x1xf32> to vector<8x128xf32>
      %76 = vector.broadcast %cst_20 : f32 to vector<8x128xf32>
      %77 = arith.select %73, %75, %76 : vector<8x128xi1>, vector<8x128xf32>
      %78 = arith.addf %66, %77 : vector<8x128xf32>
      %79 = arith.index_cast %1 : i32 to index
      %c0_21 = arith.constant 0 : index
      %80 = vector.load %arg8[%79, %c0_21] : memref<8x128xf32, #tpu.memory_space<vmem>>, vector<8x128xf32>
      tpu.vector_store %arg8[%79, %c0_21], %78 {strides = array<i32>} : memref<8x128xf32, #tpu.memory_space<vmem>>, vector<8x128xf32>,
      %cst_22 = arith.constant 0xFF800000 : f32
      %81 = vector.shape_cast %6 : vector<8x1xi1> to vector<8x1xi1>
      %82 = vector.broadcast %81 : vector<8x1xi1> to vector<8x128xi1>
      %83 = vector.broadcast %cst_22 : f32 to vector<8x128xf32>
      %84 = arith.select %82, %78, %83 : vector<8x128xi1>, vector<8x128xf32>
      %c0_23 = arith.constant 0 : index
      %c0_24 = arith.constant 0 : index
      %85 = vector.load %arg9[%c0_23, %c0_24] : memref<1x128xf32, #tpu.memory_space<vmem>>, vector<1x128xf32>
      %cst_25 = arith.constant dense<0xFF800000> : vector<128xf32>
      %86 = vector.multi_reduction <maximumf>, %84, %cst_25 [0] : vector<8x128xf32> to vector<128xf32>
      %87 = vector.shape_cast %86 : vector<128xf32> to vector<1x128xf32>
      %88 = arith.maximumf %85, %87 : vector<1x128xf32>
      %89 = vector.broadcast %88 : vector<1x128xf32> to vector<8x128xf32>
      %90 = arith.subf %78, %89 : vector<8x128xf32>
      %91 = math.exp %90 : vector<8x128xf32>
      %cst_26 = arith.constant 0.000000e+00 : f32
      %92 = vector.shape_cast %6 : vector<8x1xi1> to vector<8x1xi1>
      %93 = vector.broadcast %92 : vector<8x1xi1> to vector<8x128xi1>
      %94 = vector.broadcast %cst_26 : f32 to vector<8x128xf32>
      %95 = arith.select %93, %91, %94 : vector<8x128xi1>, vector<8x128xf32>
      %c0_27 = arith.constant 0 : index
      %c0_28 = arith.constant 0 : index
      %96 = vector.load %arg10[%c0_27, %c0_28] : memref<1x128xf32, #tpu.memory_space<vmem>>, vector<1x128xf32>
      %c0_29 = arith.constant 0 : index
      %c0_30 = arith.constant 0 : index
      %97 = vector.load %arg9[%c0_29, %c0_30] : memref<1x128xf32, #tpu.memory_space<vmem>>, vector<1x128xf32>
      %98 = arith.subf %97, %88 : vector<1x128xf32>
      %99 = math.exp %98 : vector<1x128xf32>
      %100 = arith.mulf %96, %99 : vector<1x128xf32>
      %cst_31 = arith.constant dense<0.000000e+00> : vector<128xf32>
      %101 = vector.multi_reduction <add>, %95, %cst_31 [0] : vector<8x128xf32> to vector<128xf32>
      %102 = vector.shape_cast %101 : vector<128xf32> to vector<1x128xf32>
      %103 = arith.addf %100, %102 : vector<1x128xf32>
      %c0_32 = arith.constant 0 : index
      %c0_33 = arith.constant 0 : index
      %104 = vector.load %arg10[%c0_32, %c0_33] : memref<1x128xf32, #tpu.memory_space<vmem>>, vector<1x128xf32>
      tpu.vector_store %arg10[%c0_32, %c0_33], %103 {strides = array<i32>} : memref<1x128xf32, #tpu.memory_space<vmem>>, vector<1x128xf32>,
      %c0_34 = arith.constant 0 : index
      %c0_35 = arith.constant 0 : index
      %105 = vector.load %arg9[%c0_34, %c0_35] : memref<1x128xf32, #tpu.memory_space<vmem>>, vector<1x128xf32>
      tpu.vector_store %arg9[%c0_34, %c0_35], %88 {strides = array<i32>} : memref<1x128xf32, #tpu.memory_space<vmem>>, vector<1x128xf32>,
    } else {
    }
    %c1_i32 = arith.constant 1 : i32
    %10 = arith.cmpi eq, %arg0, %c1_i32 : i32
    %11 = arith.extui %10 : i1 to i32
    %c0_i32_2 = arith.constant 0 : i32
    %12 = arith.cmpi ne, %11, %c0_i32_2 : i32
    scf.if %12 {
      %13 = arith.index_cast %1 : i32 to index
      %c0 = arith.constant 0 : index
      %14 = vector.load %arg8[%13, %c0] : memref<8x128xf32, #tpu.memory_space<vmem>>, vector<8x128xf32>
      %c0_3 = arith.constant 0 : index
      %c0_4 = arith.constant 0 : index
      %15 = vector.load %arg10[%c0_3, %c0_4] : memref<1x128xf32, #tpu.memory_space<vmem>>, vector<1x128xf32>
      %16 = tpu.reciprocal %15 : vector<1x128xf32> -> vector<1x128xf32>
      %c0_5 = arith.constant 0 : index
      %c0_6 = arith.constant 0 : index
      %17 = vector.load %arg9[%c0_5, %c0_6] : memref<1x128xf32, #tpu.memory_space<vmem>>, vector<1x128xf32>
      %18 = vector.broadcast %17 : vector<1x128xf32> to vector<8x128xf32>
      %19 = arith.subf %14, %18 : vector<8x128xf32>
      %20 = math.exp %19 : vector<8x128xf32>
      %21 = vector.broadcast %16 : vector<1x128xf32> to vector<8x128xf32>
      %22 = arith.mulf %20, %21 : vector<8x128xf32>
      %cst = arith.constant 0.000000e+00 : f32
      %23 = vector.shape_cast %6 : vector<8x1xi1> to vector<8x1xi1>
      %24 = vector.broadcast %23 : vector<8x1xi1> to vector<8x128xi1>
      %25 = vector.broadcast %cst : f32 to vector<8x128xf32>
      %26 = arith.select %24, %22, %25 : vector<8x128xi1>, vector<8x128xf32>
      %c0_7 = arith.constant 0 : index
      %c0_8 = arith.constant 0 : index
      %27 = vector.load %arg7[%c0_7, %c0_8] : memref<8x128xf32, #tpu.memory_space<vmem>>, vector<8x128xf32>
      tpu.vector_store %arg7[%c0_7, %c0_8], %26 {strides = array<i32>} : memref<8x128xf32, #tpu.memory_space<vmem>>, vector<8x128xf32>,
    } else {
    }
    return
  }
  func.func @transform_0(%arg0: i32, %arg1: i32) -> (i32, i32) {
    %c1_i32 = arith.constant 1 : i32
    %0 = arith.subi %c1_i32, %arg0 : i32
    %1 = arith.muli %0, %arg1 : i32
    %c0_i32 = arith.constant 0 : i32
    %c0_i32_0 = arith.constant 0 : i32
    return %1, %c0_i32 : i32, i32
  }
  func.func @transform_1(%arg0: i32, %arg1: i32) -> (i32, i32) {
    %c0_i32 = arith.constant 0 : i32
    %c0_i32_0 = arith.constant 0 : i32
    %c0_i32_1 = arith.constant 0 : i32
    return %c0_i32, %c0_i32_0 : i32, i32
  }
  func.func @transform_2(%arg0: i32, %arg1: i32) -> (i32, i32) {
    %c0_i32 = arith.constant 0 : i32
    %c0_i32_0 = arith.constant 0 : i32
    %c0_i32_1 = arith.constant 0 : i32
    return %c0_i32, %c0_i32_0 : i32, i32
  }
  func.func @transform_3(%arg0: i32, %arg1: i32) -> (i32, i32) {
    %c0_i32 = arith.constant 0 : i32
    %c0_i32_0 = arith.constant 0 : i32
    %c0_i32_1 = arith.constant 0 : i32
    return %c0_i32, %c0_i32_0 : i32, i32
  }
  func.func @transform_4(%arg0: i32, %arg1: i32) -> (i32, i32) {
    %c0_i32 = arith.constant 0 : i32
    %c0_i32_0 = arith.constant 0 : i32
    %c0_i32_1 = arith.constant 0 : i32
    return %c0_i32, %c0_i32_0 : i32, i32
  }
  func.func @transform_5(%arg0: i32, %arg1: i32) -> (i32, i32) {
    %0 = arith.muli %arg0, %arg1 : i32
    %c0_i32 = arith.constant 0 : i32
    %c0_i32_0 = arith.constant 0 : i32
    return %0, %c0_i32 : i32, i32
  }
}

</mosaic_0001>

<bundles_post_ra>
// kernel: tpu_custom_call.1
= control target key start
LH: loop header
LB: loop body
LE: loop exit
PB: predicated region body
PF: predicated region fallthrough
CT: control target
= control target key end

     0   :  { %10 = vsyncpa [#allocation6], 0  ;;  %s856_s0 = inlined_call_operand.vmem [shape: f32[8,4], index: 0, kind: input, shape index: {}]   ;;  %s857_s1 = inlined_call_operand.vmem [shape: f32[4,150], index: 1, kind: input, shape index: {}]   ;;  %s858_s2 = inlined_call_operand.vmem [shape: f32[1,150], index: 2, kind: input, shape index: {}]   ;;  %s859_s3 = inlined_call_operand.vmem [shape: f32[2,150], index: 3, kind: input, shape index: {}]   ;;  %s860_s4 = inlined_call_operand.vmem [shape: f32[1,128], index: 4, kind: input, shape index: {}]   ;;  %s861_s5 = inlined_call_operand.hbm [shape: f32[8,128], index: 5, kind: output, shape index: {}]  }
   0x1   :  { %12 = vsyncpa [#allocation6 + $0x1], 0  ;;  %s769_s18 = smov 0   ;;  %s771_s19 = smov 0  }
   0x2   :  { %s773_s20 = smov 0  }
   0x3 LB: > { %s609_s21 = sadd.s32 4294967295, %s730_s20   ;;  %s610_s22 = sadd.s32 4294967294, %s730_s20   ;;  %s730_s20 = sphi %s773_s20, %s18_s20   ;;  %s726_s19 = sphi %s771_s19, %s864_s19   ;;  %s722_s18 = sphi %s769_s18, %s863_s18  }
   0x4   : > { %s30_s23 = sadd.s32 1, %s726_s19  ;;  %p614_p0 = scmp.ge.s32.totalorder %s730_s20, 1 }
   0x5   : > { %p32_p1 = scmp.ge.s32.totalorder %s30_s23, 2  ;;  %p211_p2 = scmp.lt.s32.totalorder %s730_s20, 3 }
   0x7   : > { %s866_s23 = smov (%p32_p1, %s30_s23), 0  ;;  %p212_p3 = pnand %p614_p0, %p211_p2 }
   0x8   : > { %p615_p4 = scmp.ne.s32.totalorder (!%p212_p3), %s722_s18, 0 }
   0x9   : > { %215 = sbr.rel (%p212_p3) target bundleno = 406 (0x196), region = 40 }
  0x10   : > { %258 = sbr.rel (%p615_p4) target bundleno = 360 (0x168), region = 44  ;;  %v265_v0 = vld [vmem:[%s856_s0] sm:$0xff] (!%p615_p4)  ;;  %v732_v1 = vmov (!%p615_p4), 0   ;;  %v733_v2 = vmov (!%p615_p4), 2   ;;  %v734_v3 = vmov (!%p615_p4), 1   ;;  %v735_v4 = vmov (!%p615_p4), 3  }
  0x11   : > { %665 = vset.pattern.permute.xlu0 (!%p615_p4), %v732_v1  ;;  %667 = vset.pattern.permute.xlu1 (!%p615_p4), %v733_v2  ;;  %v269_v5 = vlaneseq (!%p615_p4)  ;;  %v266_v9 = vld [vmem:[%s857_s1] sm:$0xff] (!%p615_p4)  ;;  %vm422_vm2 = vcmask (!%p615_p4), 179200  }
  0x12   : > { %281 = vperm.xlu0 (!%p615_p4), %665, %v265_v0   ;;  %334 = vperm.xlu1 (!%p615_p4), %667, %v265_v0   ;;  %v267_v18 = vld [vmem:[%s858_s2] sm:$0x3] (!%p615_p4) }
  0x13   : > { %v270_v6 = vshrl.u32 (!%p615_p4), %v269_v5, 7  ;;  %v391_v45 = vld [vmem:[%s859_s3] sm:$0xf] (!%p615_p4) }
  0x15   : > { %v796_v7 = vsub.s32 (!%p615_p4), 0, %v270_v6  ;;  %v291_v8 = vsub.s32 (!%p615_p4), 4, %v270_v6  ;;  %v275_v10 = vsub.s32 (!%p615_p4), 1, %v270_v6  ;;  %v317_v13 = vsub.s32 (!%p615_p4), 5, %v270_v6 }
  0x16   : > { %666 = vset.pattern.permute.xlu0 (!%p615_p4), %v734_v3  ;;  %668 = vset.pattern.permute.xlu1 (!%p615_p4), %v735_v4  ;;  %v339_v14 = vsub.s32 (!%p615_p4), 2, %v270_v6  ;;  %v343_v15 = vsub.s32 (!%p615_p4), 6, %v270_v6  ;;  %v365_v16 = vsub.s32 (!%p615_p4), 3, %v270_v6  ;;  %v369_v17 = vsub.s32 (!%p615_p4), 7, %v270_v6 }
  0x17   : > { %308 = vperm.xlu0 %666, %v265_v0   ;;  %360 = vperm.xlu1 %668, %v265_v0   ;;  %v288_v11 = vrot.slane %v266_v9, %v796_v7  ;;  %v292_v12 = vrot.slane %v266_v9, %v291_v8  ;;  %v314_v21 = vrot.slane %v266_v9, %v275_v10 }
  0x18   : > { %v318_v22 = vrot.slane %v266_v9, %v317_v13  ;;  %v340_v23 = vrot.slane %v266_v9, %v339_v14  ;;  %v344_v24 = vrot.slane %v266_v9, %v343_v15  ;;  %v366_v27 = vrot.slane %v266_v9, %v365_v16 }
  0x19   : > { %v298_v19 = vrot.slane %v288_v11, %v796_v7  ;;  %v302_v20 = vrot.slane %v292_v12, %v796_v7  ;;  %v370_v28 = vrot.slane %v266_v9, %v369_v17  ;;  %v272_v29 = vrot.slane %v267_v18, %v796_v7  ;;  %v616_v17 = vld [vmem:[%s860_s4] ss:$0 sm:$0xff] }
  0x1a   : > { %v276_v30 = vrot.slane %v267_v18, %v275_v10  ;;  %v324_v33 = vrot.slane %v314_v21, %v275_v10  ;;  %v328_v34 = vrot.slane %v318_v22, %v275_v10  ;;  %v350_v35 = vrot.slane %v340_v23, %v339_v14 }
  0x1b   : > { %669 = vset.pattern.permute.xlu0 %v735_v4  ;;  %v354_v36 = vrot.slane %v344_v24, %v339_v14  ;;  %v376_v37 = vrot.slane %v366_v27, %v365_v16  ;;  %v380_v38 = vrot.slane %v370_v28, %v365_v16  ;;  %v433_v52 = vrot.slane %v391_v45, %v275_v10 }
  0x1c   : > { %v437_v53 = vrot.slane %v391_v45, %v365_v16  ;;  %v405_v54 = vrot.slane %v391_v45, %v796_v7  ;;  %v409_v55 = vrot.slane %v391_v45, %v339_v14  ;;  %v737_v15 = vmov 0.0  }
  0x1d   : > { %v443_v60 = vrot.slane %v433_v52, %v275_v10  ;;  %264 = vst [vmem:[#allocation4] sm:$0x1] %v737_v15  ;;  %v393_v16 = vand.u32 127, %v269_v5 }
  0x1e   : > { %v447_v61 = vrot.slane %v437_v53, %v275_v10  ;;  %v415_v62 = vrot.slane %v405_v54, %v796_v7  ;;  %v419_v63 = vrot.slane %v409_v55, %v796_v7  ;;  %v736_v10 = vmov -inf  }
  0x1f   : > { %263 = vst [vmem:[#allocation3] sm:$0x1] %v736_v10  ;;  %vm427_vm3 = vcmp.eq.s32.totalorder %v393_v16, 0  ;;  %vm454_vm4 = vcmp.eq.s32.totalorder %v393_v16, 1 }
  0x91   : > { %v282_v25 = vpop.permute.xlu0 %281  ;;  %v335_v26 = vpop.permute.xlu1 %334 }
  0x92   : > { %v303_v31 = vmul.f32 %v298_v19, %v282_v25  ;;  %v304_v32 = vmul.f32 %v302_v20, %v282_v25  ;;  %v355_v46 = vmul.f32 %v350_v35, %v335_v26  ;;  %v356_v47 = vmul.f32 %v354_v36, %v335_v26 }
  0x94   : > { %v305_v41 = vadd.f32 %v303_v31, %v272_v29  ;;  %v306_v42 = vadd.f32 %v304_v32, %v276_v30  ;;  %v462_v29 = vld [vmem:[#allocation3] sm:$0x1] }
  0x96   : > { %v309_v39 = vpop.permute.xlu0 %308  ;;  %v361_v40 = vpop.permute.xlu1 %360 }
  0x97   : > { %v329_v43 = vmul.f32 %v324_v33, %v309_v39  ;;  %v330_v44 = vmul.f32 %v328_v34, %v309_v39  ;;  %v381_v50 = vmul.f32 %v376_v37, %v361_v40  ;;  %v382_v51 = vmul.f32 %v380_v38, %v361_v40 }
  0x99   : > { %v331_v48 = vadd.f32 %v329_v43, %v305_v41  ;;  %v332_v49 = vadd.f32 %v330_v44, %v306_v42  ;;  %v480_v42 = vld [vmem:[#allocation4] sm:$0x1] }
  0x9b   : > { %v357_v56 = vadd.f32 %v355_v46, %v331_v48  ;;  %v358_v57 = vadd.f32 %v356_v47, %v332_v49 }
  0x9d   : > { %v383_v58 = vadd.f32 %v381_v50, %v357_v56  ;;  %v384_v59 = vadd.f32 %v382_v51, %v358_v57 }
  0x9f   : > { %v387_v0 = vmul.f32 0.01, %v383_v58  ;;  %v388_v1 = vmul.f32 0.01, %v384_v59  ;;  %vm385_vm0 = vcmp.ge.f32.partialorder %v383_v58, 0.0  ;;  %vm386_vm1 = vcmp.ge.f32.partialorder %v384_v59, 0.0 }
  0xa1   : > { %v389_v2 = vsel %vm385_vm0, %v383_v58, %v387_v0  ;;  %v390_v3 = vsel %vm386_vm1, %v384_v59, %v388_v1 }
  0xa2   : > { %v448_v4 = vmul.f32 %v443_v60, %v389_v2  ;;  %v449_v6 = vmul.f32 %v447_v61, %v390_v3  ;;  %v420_v8 = vmul.f32 %v415_v62, %v389_v2  ;;  %v421_v9 = vmul.f32 %v419_v63, %v390_v3 }
  0xa4   : > { %v450_v11 = vsel %vm422_vm2, %v449_v6, 0.0  ;;  %v423_v12 = vsel %vm422_vm2, %v421_v9, 0.0 }
  0xa5   : > { %v451_v13 = vadd.f32 %v450_v11, %v448_v4  ;;  %v424_v14 = vadd.f32 %v423_v12, %v420_v8 }
  0xa7   : > { %452 = vadd.xlane.f32.xlu0 %v451_v13  ;;  %425 = vadd.xlane.f32.xlu1 %v424_v14 }
 0x134   : > { %v453_v18 = vpop.xlane.xlu0 %452  ;;  %v426_v19 = vpop.xlane.xlu1 %425 }
 0x135   : > { %v428_v20 = vsel %vm427_vm3, %v426_v19, 0.0  ;;  %v455_v22 = vsel %vm454_vm4, %v453_v18, 0.0 }
 0x136   : > { %v429_v21 = vadd.f32 %v616_v17, %v428_v20 }
 0x138   : > { %v456_v23 = vadd.f32 %v455_v22, %v429_v21 }
 0x13a   : > { %458 = vst [vmem:[#allocation2] sm:$0xff] %v456_v23  ;;  %v463_v24 = vrot.slane %v456_v23, 4 }
 0x13c   : > { %v464_v25 = vmax.f32 %v456_v23, %v463_v24 }
 0x13e   : > { %v465_v26 = vrot.slane %v464_v25, 2 }
 0x140   : > { %v466_v27 = vmax.f32 %v464_v25, %v465_v26 }
 0x142   : > { %v467_v28 = vrot.slane %v466_v27, 1 }
 0x144   : > { %v468_v5 = vmax.f32 %v466_v27, %v467_v28 }
 0x146   : > { %v469_v30 = vmax.f32 %v462_v29, %v468_v5 }
 0x148   : > { %v474_v31 = vrot.slane %v469_v30, %v796_v7  ;;  %493 = vst [vmem:[#allocation3] sm:$0x1] %v469_v30  ;;  %v481_v34 = vsub.f32 %v462_v29, %v469_v30 }
 0x14a   : > { %v476_v32 = vsub.f32 %v456_v23, %v474_v31  ;;  %v482_v35 = vmul.f32 1.442695, %v481_v34 }
 0x14c   : > { %v477_v33 = vmul.f32 1.442695, %v476_v32 }
 0x14e   : > { %670 = vpow2.f32 %v477_v33 }
 0x14f   : > { %672 = vpow2.f32 %v482_v35 }
 0x158   : > { %v671_v36 = vpop.eup %670 }
 0x159   : > { %v485_v37 = vrot.slane %v671_v36, 4  ;;  %v673_v41 = vpop.eup %672 }
 0x15a   : > { %v484_v44 = vmul.f32 %v673_v41, %v480_v42 }
 0x15b   : > { %v486_v38 = vadd.f32 %v671_v36, %v485_v37 }
 0x15d   : > { %v487_v39 = vrot.slane %v486_v38, 2 }
 0x15f   : > { %v488_v40 = vadd.f32 %v487_v39, %v486_v38 }
 0x161   : > { %v489_v43 = vrot.slane %v488_v40, 1 }
 0x163   : > { %v490_v45 = vadd.f32 %v489_v43, %v488_v40 }
 0x165   : > { %v491_v46 = vadd.f32 %v490_v45, %v484_v44 }
 0x167   : > { %492 = vst [vmem:[#allocation4] sm:$0x1] %v491_v46 }
 0x168 PF: > { %p617_p5 = scmp.ne.s32.totalorder %s722_s18, 1 }
 0x169   : > { %v499_v7 = vld [vmem:[#allocation2] sm:$0xff] (!%p617_p5)  ;;  %v618_v48 = vld [vmem:[#allocation3] ss:$0 sm:$0xff] (!%p617_p5)  ;;  %v513_v49 = vlaneseq (!%p617_p5) }
 0x16a   : > { %497 = sbr.rel (%p617_p5) target bundleno = 383 (0x17f), region = 52  ;;  %v509_v50 = vsub.f32 (!%p617_p5), %v499_v7, %v618_v48 }
 0x16b   : > { %v514_v52 = vshrl.u32 (!%p617_p5), %v513_v49, 7 }
 0x16c   : > { %v510_v51 = vmul.f32 (!%p617_p5), 1.442695, %v509_v50 }
 0x16d   : > { %v515_v53 = vsub.s32 (!%p617_p5), 0, %v514_v52 }
 0x16e   : > { %v500_v47 = vld [vmem:[#allocation4] sm:$0x1] (!%p617_p5) }
 0x16f   : > { %674 = vrcp.f32 (!%p617_p5), %v500_v47 }
 0x170   : > { %676 = vpow2.f32 (!%p617_p5), %v510_v51 }
 0x179   : > { %v675_v54 = vpop.eup %674 }
 0x17a   : > { %v516_v55 = vrot.slane %v675_v54, %v515_v53  ;;  %v677_v56 = vpop.eup %676 }
 0x17c   : > { %v518_v57 = vmul.f32 %v677_v56, %v516_v55 }
 0x17e   : > { %522 = vst [vmem:[#allocation5] sm:$0xff] %v518_v57 }
 0x17f PF: > { %p822_p6 = scmp.eq.s32.totalorder %s609_s21, 1  ;;  %s738_s10 = smov [#allocation5]  }
 0x180   : > { %s538_s11 = sshll.u32 %s738_s10, 4  ;;  %s539_s11 = int_to_ptr.vmem [resolvable:$true] %s538_s11 }
 0x181   : > { %s678_s12 = scalar_lea.vmem %s539_s11, 128  ;;  %s684_s13 = scalar_lea.vmem %s539_s11, 256 }
 0x182   : > { %p679_p7 = scmp.ne.s32.totalorder %s539_s11, %s678_s12  ;;  %p685_p10 = scmp.lt.s32.totalorder %s539_s11, %s539_s11 }
 0x183   : > { %p686_p11 = scmp.lt.s32.totalorder %s684_s13, %s678_s12 }
 0x184   : > { %p680_p8 = pnand %p679_p7, %p822_p6 }
 0x185   : > { %p687_p12 = por %p686_p11, %p685_p10 }
 0x186   : > { %p681_p9 = pneg %p680_p8 }
 0x188   : > { %p688_p13 = pnand %p687_p12, %p681_p9 }
 0x18a   : > { %691 = shalt.err (!%p688_p13)
}
 0x18b   : > { %s692_s16 = scalar_lea.hbm %s861_s5, 128 }
 0x18c   : > { %p693_p0 = scmp.ne.s32.totalorder %s861_s5, %s692_s16  ;;  %p698_p3 = scmp.lt.u32.totalorder %s692_s16, %s861_s5 }
 0x18e   : > { %p694_p1 = pnand %p693_p0, %p822_p6 }
 0x190   : > { %p695_p2 = pneg %p694_p1 }
 0x192   : > { %p700_p4 = pnand %p698_p3, %p695_p2 }
 0x194   : > { %703 = shalt.err (!%p700_p4)
}
 0x195   : > { %624 = dma.vmem_to_hbm [thread:$0]  (%p822_p6), %s539_s11, 128, %s861_s5, [#allocation6]  }
 0x196 PF: > { %p632_p5 = scmp.ge.s32.totalorder %s730_s20, 2  ;;  %p633_p7 = scmp.eq.s32.totalorder %s610_s22, 1 }
 0x198   : > { %p628_p8 = pnand %p633_p7, %p632_p5 }
 0x19a   : > { %717 = dma.done.wait (!%p628_p8), [#allocation6], 128  }
 0x19b   : > { %719 = vsyncadd (!%p628_p8), [#allocation6], 4294967168  ;;  %s18_s20 = sadd.s32 1, %s730_s20   ;;  %s863_s18 = smov %s726_s19 }
 0x19c   : > { %p15_p9 = scmp.ge.s32.totalorder %s18_s20, 4   ;;  %s864_s19 = smov %s866_s23 }
 0x19e   :  { %17 = sbr.rel (!%p15_p9) target bundleno = 3 (0x3), region = 89 }
 0x1a5   :  { %556 = vsyncpa [#allocation6], 1 }
 0x1a6   :  { %558 = vsyncpa [#allocation6 + $0x1], 1 }

</bundles_post_ra>
